<compile_context>
chip_gen: v7x
topology: tpu7x:2x2x1
jax: 0.10.0
libtpu: 0.0.40
codegen_flags: <defaults>
</compile_context>

<pallas_src>
import functools

import jax
import jax.numpy as jnp
from jax.experimental import pallas as pl
from jax.experimental.pallas import tpu as pltpu

_MIB = 1024 * 1024


def _round_up(x, m):
    return ((x + m - 1) // m) * m


# ---------------------------------------------------------------------------
# Kernel
# ---------------------------------------------------------------------------
def adapter_kernel(x_ref, gamma_ref, beta_ref, wd_ref, bd_ref, wu_ref, bu_ref,
                   o_ref, *, eps):
    """Fused LayerNorm -> project_down -> ReLU -> project_up -> residual."""
    # ---- LayerNorm statistics in f32 over the true feature dim ----
    x = x_ref[...].astype(jnp.float32)                       # (rt, nx)
    inv_n = 1.0 / x.shape[-1]
    mean = jnp.sum(x, axis=-1, keepdims=True) * inv_n
    # E[x^2] - mean^2: one fewer full-slab VPU pass than the centered form and
    # no lane masking needed (clamped at 0 for numerical safety).
    sumsq = jnp.sum(x * x, axis=-1, keepdims=True) * inv_n
    var = jnp.maximum(sumsq - mean * mean, 0.0)
    inv_std = jax.lax.rsqrt(var + eps)
    xn = (x - mean) * inv_std                                 # f32

    # ---- scale-shift + MXU feed in the weight dtype ----
    mxu_dtype = wd_ref.dtype
    if mxu_dtype == jnp.bfloat16:
        # bf16 VALU on v6e/v7x; the result is cast for the MXU anyway.
        xn_s = (xn.astype(mxu_dtype) * gamma_ref[...].astype(mxu_dtype)
                + beta_ref[...].astype(mxu_dtype))
    else:
        xn_s = (xn * gamma_ref[...].astype(jnp.float32)
                + beta_ref[...].astype(jnp.float32)).astype(mxu_dtype)

    # ---- project_down + ReLU (MXU, f32 accumulation) ----
    h = jnp.dot(xn_s, wd_ref[...], preferred_element_type=jnp.float32)
    h = jnp.maximum(h + bd_ref[...].astype(jnp.float32), 0.0)

    # ---- project_up ----
    y = jnp.dot(h.astype(mxu_dtype), wu_ref[...],
                preferred_element_type=jnp.float32)
    y = y + bu_ref[...].astype(jnp.float32)

    # ---- residual add: re-read x_ref (already in VMEM) so the f32 copy of x
    #      does not have to stay live across both matmuls ----
    o_ref[...] = (x_ref[...].astype(jnp.float32) + y).astype(o_ref.dtype)


# ---------------------------------------------------------------------------
# Capability probe: single-buffering of constant-index blocks
# ---------------------------------------------------------------------------
def _probe_copy_kernel(x_ref, o_ref):
    o_ref[...] = x_ref[...]


@functools.lru_cache(maxsize=None)
def _single_buffering_supported():
    """Check once whether pipeline_mode=pl.Buffered(1) is accepted here."""
    try:
        fn = pl.pallas_call(
            _probe_copy_kernel,
            out_shape=jax.ShapeDtypeStruct((8, 128), jnp.float32),
            grid=(1,),
            in_specs=[pl.BlockSpec((8, 128), lambda i: (0, 0),
                                   pipeline_mode=pl.Buffered(1))],
            out_specs=pl.BlockSpec((8, 128), lambda i: (0, 0)),
        )
        jax.block_until_ready(fn(jnp.zeros((8, 128), jnp.float32)))
        return True
    except Exception:
        return False


# ---------------------------------------------------------------------------
# One-time parameter preparation (outside the forward hot path)
# ---------------------------------------------------------------------------
def prepare_adapter_params(params, *, compute_dtype=None):
    """Pads the bottleneck dim to a multiple of 128 (zero pad: padded hidden
    units stay exactly 0 through the ReLU and contribute nothing), reshapes
    vectors to (1, dim), and optionally casts the matmul weights to
    `compute_dtype` (bf16 recommended: native MXU dtype on v5e/v6e/v7x)."""
    gamma, beta = params["ln_gamma"], params["ln_beta"]
    wd, bd = params["w_down"], params["b_down"]
    wu, bu = params["w_up"], params["b_up"]
    nx, bn = wd.shape
    bn_p = _round_up(bn, 128)
    if compute_dtype is not None:
        wd = wd.astype(compute_dtype)
        wu = wu.astype(compute_dtype)
    return {
        "ln_gamma": gamma.reshape(1, nx),
        "ln_beta": beta.reshape(1, nx),
        "w_down": jnp.pad(wd, ((0, 0), (0, bn_p - bn))),
        "b_down": jnp.pad(bd, (0, bn_p - bn)).reshape(1, bn_p),
        "w_up": jnp.pad(wu, ((0, bn_p - bn), (0, 0))),
        "b_up": bu.reshape(1, nx),
    }


# ---------------------------------------------------------------------------
# Forward wrapper
# ---------------------------------------------------------------------------
def adapter_forward(x, params, *, eps=1e-5, row_tile=512):
    """x: (B, S, nx) -> (B, S, nx). `params` should come from
    prepare_adapter_params (raw params are accepted as a convenience)."""
    if params["ln_gamma"].ndim == 1:          # convenience path, not the hot path
        params = prepare_adapter_params(params)

    B, S, nx = x.shape
    rows = B * S
    dtype = x.dtype
    itemsize = jnp.dtype(dtype).itemsize

    gamma, beta = params["ln_gamma"], params["ln_beta"]
    wd, bd = params["w_down"], params["b_down"]
    wu, bu = params["w_up"], params["b_up"]
    bn_p = wd.shape[1]
    w_itemsize = jnp.dtype(wd.dtype).itemsize

    # ---- generation-aware budgets ----
    try:
        vmem_cap = int(pltpu.get_tpu_info().vmem_capacity_bytes)
    except Exception:
        vmem_cap = 64 * _MIB                   # conservative (v7x-sized) fallback
    act_budget = 14 * _MIB if vmem_cap <= 64 * _MIB else 24 * _MIB

    # ---- row tiling: sublane-aligned tile, ragged last block via cdiv ----
    sub = max(8, 32 // itemsize)               # 8 (f32) / 16 (bf16) / 32 (int8)
    rows_p = _round_up(rows, sub)              # tiny pad; usually a no-op
    # Per-row VMEM: double-buffered x+out tiles plus f32 intermediates
    # (xn, y, one temp) and the (rt, bn_p) hidden activation.
    per_row = 4 * nx * itemsize + (3 * nx + bn_p) * 4
    max_rt = max(sub, (act_budget // per_row) // sub * sub)
    rt = max(sub, min(_round_up(max(row_tile, sub), sub), max_rt, rows_p))
    grid = (pl.cdiv(rows_p, rt),)

    x2d = x.reshape(rows, nx)
    if rows_p != rows:                          # only the sublane residual, if any
        x2d = jnp.pad(x2d, ((0, rows_p - rows), (0, 0)))

    # ---- VMEM limit with headroom (never request the full v7x 64 MiB) ----
    single_buf = _single_buffering_supported()
    n_weight_bufs = 1 if single_buf else 2
    param_elems = (wd.size + wu.size + bd.size + bu.size + gamma.size + beta.size)
    weight_bytes = n_weight_bufs * param_elems * w_itemsize
    act_bytes = 4 * rt * nx * itemsize          # x + out tiles, double-buffered
    interm_bytes = (3 * nx + bn_p) * rt * 4     # f32 LN / matmul intermediates
    vmem_need = weight_bytes + act_bytes + interm_bytes
    vmem_limit = int(max(32 * _MIB, min(vmem_cap - 12 * _MIB, 2 * vmem_need)))

    # ---- advisory cost estimate (mem-bound custom call) ----
    cost = pl.CostEstimate(
        flops=int(4 * rows * nx * bn_p + 10 * rows * nx),
        transcendentals=int(rows),
        bytes_accessed=int(2 * rows * nx * itemsize + param_elems * w_itemsize),
    )

    if single_buf:
        def const_spec(shape):
            return pl.BlockSpec(shape, lambda i: (0, 0),
                                pipeline_mode=pl.Buffered(1))
    else:
        # TODO(synk): drop fallback once Buffered(1) is universally available.
        def const_spec(shape):
            return pl.BlockSpec(shape, lambda i: (0, 0))

    kernel = functools.partial(adapter_kernel, eps=eps)

    out2d = pl.pallas_call(
        kernel,
        out_shape=jax.ShapeDtypeStruct((rows_p, nx), dtype),
        grid_spec=pltpu.PrefetchScalarGridSpec(
            num_scalar_prefetch=0,
            grid=grid,
            in_specs=[
                pl.BlockSpec((rt, nx), lambda i: (i, 0)),   # x tile (full nx lanes)
                const_spec((1, nx)),                        # gamma
                const_spec((1, nx)),                        # beta
                const_spec((nx, bn_p)),                     # W_down
                const_spec((1, bn_p)),                      # b_down
                const_spec((bn_p, nx)),                     # W_up
                const_spec((1, nx)),                        # b_up
            ],
            out_specs=pl.BlockSpec((rt, nx), lambda i: (i, 0)),
        ),
        compiler_params=pltpu.CompilerParams(
            dimension_semantics=("parallel",),   # v7x: both TCs split the row axis
            vmem_limit_bytes=vmem_limit,
        ),
        cost_estimate=cost,
    )(x2d, gamma, beta, wd, bd, wu, bu)

    if rows_p != rows:
        out2d = out2d[:rows]
    return out2d.reshape(B, S, nx)


# ---------------------------------------------------------------------------
# Synthetic params + pure-JAX reference
# ---------------------------------------------------------------------------
def init_adapter_params(key, nx, bottleneck, dtype=jnp.float32):
    """PyTorch nn.Linear weight is (out, in); we store the transposed (in, out)
    form so the kernel computes x @ W directly."""
    k1, k2, k3, k4 = jax.random.split(key, 4)
    scale_d = 1.0 / jnp.sqrt(nx)
    scale_u = 1.0 / jnp.sqrt(bottleneck)
    return {
        "ln_gamma": jnp.ones((nx,), dtype),
        "ln_beta": jnp.zeros((nx,), dtype),
        "w_down": (jax.random.uniform(k1, (nx, bottleneck), dtype) * 2 - 1) * scale_d,
        "b_down": (jax.random.uniform(k2, (bottleneck,), dtype) * 2 - 1) * scale_d,
        "w_up": (jax.random.uniform(k3, (bottleneck, nx), dtype) * 2 - 1) * scale_u,
        "b_up": (jax.random.uniform(k4, (nx,), dtype) * 2 - 1) * scale_u,
    }


def adapter_reference(x, params, eps=1e-5):
    mean = jnp.mean(x, axis=-1, keepdims=True)
    var = jnp.mean((x - mean) ** 2, axis=-1, keepdims=True)
    xn = (x - mean) / jnp.sqrt(var + eps)
    xn = xn * params["ln_gamma"] + params["ln_beta"]
    h = jnp.maximum(xn @ params["w_down"] + params["b_down"], 0.0)
    y = h @ params["w_up"] + params["b_up"]
    return x + y


if __name__ == "__main__":
    key = jax.random.PRNGKey(0)
    kx, kp, kx2, kp2 = jax.random.split(key, 4)
    EPS = 1e-5

    # config.n_embd = 32 (hidden), bottleneck = 16, batch = 2, seq = 8
    B, S, NX, BOTTLENECK = 2, 8, 32, 16
    x = jax.random.normal(kx, (B, S, NX), dtype=jnp.float32)
    params = init_adapter_params(kp, NX, BOTTLENECK)
    prepared = prepare_adapter_params(params)          # one-time, off the hot path
    out = jax.block_until_ready(adapter_forward(x, prepared, eps=EPS))
    ref = adapter_reference(x, params, eps=EPS)
    assert out.shape == x.shape
    assert jnp.allclose(out, ref, atol=1e-4, rtol=1e-4), "f32 mismatch vs reference"

    # Ragged / unaligned shapes: rows not a multiple of 8, nx not a multiple of
    # 128 -> exercises the partial last row-block and the sublane row pad.
    B2, S2, NX2, BN2 = 3, 50, 160, 48
    x2 = jax.random.normal(kx2, (B2, S2, NX2), dtype=jnp.float32)
    params2 = init_adapter_params(kp2, NX2, BN2)
    out2 = jax.block_until_ready(
        adapter_forward(x2, prepare_adapter_params(params2), eps=EPS, row_tile=64))
    ref2 = adapter_reference(x2, params2, eps=EPS)
    assert jnp.allclose(out2, ref2, atol=1e-4, rtol=1e-4), "ragged mismatch vs reference"

    # bf16 matmul path (native MXU dtype on v5e/v6e/v7x); LN stats stay in f32.
    prepared_bf16 = prepare_adapter_params(params, compute_dtype=jnp.bfloat16)
    out3 = jax.block_until_ready(adapter_forward(x, prepared_bf16, eps=EPS))
    assert jnp.allclose(out3, ref, atol=1e-1, rtol=1e-1), "bf16 mismatch vs reference"

    print("KERNEL_OK")
</pallas_src>

<mosaic_0001>
module attributes {stable_mosaic.version = 11 : i64} {
  func.func @_probe_copy_kernel(%arg0: i32, %arg1: memref<8x128xf32, #tpu.memory_space<vmem>>, %arg2: memref<8x128xf32, #tpu.memory_space<vmem>>) attributes {dimension_semantics = [#tpu.dimension_semantics<arbitrary>], iteration_bounds = array<i64: 1>, scalar_prefetch = 0 : i64, scratch_operands = 0 : i64, tpu.core_type = #tpu.core_type<tc>, window_params = [{pipeline_mode = #tpu.pipeline_mode<synchronous>, transform_indices = @transform_0, window_bounds = array<i64: 8, 128>}, {pipeline_mode = #tpu.pipeline_mode<synchronous>, transform_indices = @transform_1, window_bounds = array<i64: 8, 128>}]} {
    %c0 = arith.constant 0 : index
    %c0_0 = arith.constant 0 : index
    %0 = vector.load %arg1[%c0, %c0_0] : memref<8x128xf32, #tpu.memory_space<vmem>>, vector<8x128xf32>
    %c0_1 = arith.constant 0 : index
    %c0_2 = arith.constant 0 : index
    %1 = vector.load %arg2[%c0_1, %c0_2] : memref<8x128xf32, #tpu.memory_space<vmem>>, vector<8x128xf32>
    tpu.vector_store %arg2[%c0_1, %c0_2], %0 {strides = array<i32>} : memref<8x128xf32, #tpu.memory_space<vmem>>, vector<8x128xf32>,
    return
  }
  func.func @transform_0(%arg0: i32) -> (i32, i32) {
    %c0_i32 = arith.constant 0 : i32
    %c0_i32_0 = arith.constant 0 : i32
    %c0_i32_1 = arith.constant 0 : i32
    return %c0_i32, %c0_i32_0 : i32, i32
  }
  func.func @transform_1(%arg0: i32) -> (i32, i32) {
    %c0_i32 = arith.constant 0 : i32
    %c0_i32_0 = arith.constant 0 : i32
    %c0_i32_1 = arith.constant 0 : i32
    return %c0_i32, %c0_i32_0 : i32, i32
  }
}

module attributes {stable_mosaic.version = 11 : i64} {
  func.func @adapter_kernel(%arg0: i32, %arg1: memref<16x32xf32, #tpu.memory_space<vmem>>, %arg2: memref<1x32xf32, #tpu.memory_space<vmem>>, %arg3: memref<1x32xf32, #tpu.memory_space<vmem>>, %arg4: memref<32x128xf32, #tpu.memory_space<vmem>>, %arg5: memref<1x128xf32, #tpu.memory_space<vmem>>, %arg6: memref<128x32xf32, #tpu.memory_space<vmem>>, %arg7: memref<1x32xf32, #tpu.memory_space<vmem>>, %arg8: memref<16x32xf32, #tpu.memory_space<vmem>>) attributes {dimension_semantics = [#tpu.dimension_semantics<parallel>], iteration_bounds = array<i64: 1>, scalar_prefetch = 0 : i64, scratch_operands = 0 : i64, tpu.core_type = #tpu.core_type<tc>, window_params = [{transform_indices = @transform_0, window_bounds = array<i64: 16, 32>}, {pipeline_mode = #tpu.pipeline_mode<synchronous>, transform_indices = @transform_1, window_bounds = array<i64: 1, 32>}, {pipeline_mode = #tpu.pipeline_mode<synchronous>, transform_indices = @transform_2, window_bounds = array<i64: 1, 32>}, {pipeline_mode = #tpu.pipeline_mode<synchronous>, transform_indices = @transform_3, window_bounds = array<i64: 32, 128>}, {pipeline_mode = #tpu.pipeline_mode<synchronous>, transform_indices = @transform_4, window_bounds = array<i64: 1, 128>}, {pipeline_mode = #tpu.pipeline_mode<synchronous>, transform_indices = @transform_5, window_bounds = array<i64: 128, 32>}, {pipeline_mode = #tpu.pipeline_mode<synchronous>, transform_indices = @transform_6, window_bounds = array<i64: 1, 32>}, {transform_indices = @transform_7, window_bounds = array<i64: 16, 32>}]} {
    %c0 = arith.constant 0 : index
    %c0_0 = arith.constant 0 : index
    %0 = vector.load %arg1[%c0, %c0_0] : memref<16x32xf32, #tpu.memory_space<vmem>>, vector<16x32xf32>
    %cst = arith.constant dense<0.000000e+00> : vector<16xf32>
    %1 = vector.multi_reduction <add>, %0, %cst [1] : vector<16x32xf32> to vector<16xf32>
    %2 = vector.shape_cast %1 : vector<16xf32> to vector<16x1xf32>
    %cst_1 = arith.constant 3.125000e-02 : f32
    %3 = vector.broadcast %cst_1 : f32 to vector<16x1xf32>
    %4 = arith.mulf %2, %3 : vector<16x1xf32>
    %5 = arith.mulf %0, %0 : vector<16x32xf32>
    %cst_2 = arith.constant dense<0.000000e+00> : vector<16xf32>
    %6 = vector.multi_reduction <add>, %5, %cst_2 [1] : vector<16x32xf32> to vector<16xf32>
    %7 = vector.shape_cast %6 : vector<16xf32> to vector<16x1xf32>
    %cst_3 = arith.constant 3.125000e-02 : f32
    %8 = vector.broadcast %cst_3 : f32 to vector<16x1xf32>
    %9 = arith.mulf %7, %8 : vector<16x1xf32>
    %10 = arith.mulf %4, %4 : vector<16x1xf32>
    %11 = arith.subf %9, %10 : vector<16x1xf32>
    %cst_4 = arith.constant 0.000000e+00 : f32
    %12 = vector.broadcast %cst_4 : f32 to vector<16x1xf32>
    %13 = arith.maximumf %11, %12 : vector<16x1xf32>
    %cst_5 = arith.constant 9.99999974E-6 : f32
    %14 = vector.broadcast %cst_5 : f32 to vector<16x1xf32>
    %15 = arith.addf %13, %14 : vector<16x1xf32>
    %16 = math.rsqrt %15 : vector<16x1xf32>
    %17 = vector.broadcast %4 : vector<16x1xf32> to vector<16x32xf32>
    %18 = arith.subf %0, %17 : vector<16x32xf32>
    %19 = vector.broadcast %16 : vector<16x1xf32> to vector<16x32xf32>
    %20 = arith.mulf %18, %19 : vector<16x32xf32>
    %c0_6 = arith.constant 0 : index
    %c0_7 = arith.constant 0 : index
    %21 = vector.load %arg2[%c0_6, %c0_7] : memref<1x32xf32, #tpu.memory_space<vmem>>, vector<1x32xf32>
    %22 = vector.broadcast %21 : vector<1x32xf32> to vector<16x32xf32>
    %23 = arith.mulf %20, %22 : vector<16x32xf32>
    %c0_8 = arith.constant 0 : index
    %c0_9 = arith.constant 0 : index
    %24 = vector.load %arg3[%c0_8, %c0_9] : memref<1x32xf32, #tpu.memory_space<vmem>>, vector<1x32xf32>
    %25 = vector.broadcast %24 : vector<1x32xf32> to vector<16x32xf32>
    %26 = arith.addf %23, %25 : vector<16x32xf32>
    %c0_10 = arith.constant 0 : index
    %c0_11 = arith.constant 0 : index
    %27 = vector.load %arg4[%c0_10, %c0_11] : memref<32x128xf32, #tpu.memory_space<vmem>>, vector<32x128xf32>
    %cst_12 = arith.constant dense<0.000000e+00> : vector<16x128xf32>
    %28 = tpu.matmul %26, %27, %cst_12 {dimension_numbers = #tpu.dot_dimension_numbers<[1], [0], [0], [1], [0, 0, 1, 1], [], []>} : vector<16x32xf32>, vector<32x128xf32>, vector<16x128xf32> -> vector<16x128xf32>
    %c0_13 = arith.constant 0 : index
    %c0_14 = arith.constant 0 : index
    %29 = vector.load %arg5[%c0_13, %c0_14] : memref<1x128xf32, #tpu.memory_space<vmem>>, vector<1x128xf32>
    %30 = vector.broadcast %29 : vector<1x128xf32> to vector<16x128xf32>
    %31 = arith.addf %28, %30 : vector<16x128xf32>
    %cst_15 = arith.constant 0.000000e+00 : f32
    %32 = vector.broadcast %cst_15 : f32 to vector<16x128xf32>
    %33 = arith.maximumf %31, %32 : vector<16x128xf32>
    %c0_16 = arith.constant 0 : index
    %c0_17 = arith.constant 0 : index
    %34 = vector.load %arg6[%c0_16, %c0_17] : memref<128x32xf32, #tpu.memory_space<vmem>>, vector<128x32xf32>
    %cst_18 = arith.constant dense<0.000000e+00> : vector<16x32xf32>
    %35 = tpu.matmul %33, %34, %cst_18 {dimension_numbers = #tpu.dot_dimension_numbers<[1], [0], [0], [1], [0, 0, 1, 1], [], []>} : vector<16x128xf32>, vector<128x32xf32>, vector<16x32xf32> -> vector<16x32xf32>
    %c0_19 = arith.constant 0 : index
    %c0_20 = arith.constant 0 : index
    %36 = vector.load %arg7[%c0_19, %c0_20] : memref<1x32xf32, #tpu.memory_space<vmem>>, vector<1x32xf32>
    %37 = vector.broadcast %36 : vector<1x32xf32> to vector<16x32xf32>
    %38 = arith.addf %35, %37 : vector<16x32xf32>
    %c0_21 = arith.constant 0 : index
    %c0_22 = arith.constant 0 : index
    %39 = vector.load %arg1[%c0_21, %c0_22] : memref<16x32xf32, #tpu.memory_space<vmem>>, vector<16x32xf32>
    %40 = arith.addf %39, %38 : vector<16x32xf32>
    %c0_23 = arith.constant 0 : index
    %c0_24 = arith.constant 0 : index
    %41 = vector.load %arg8[%c0_23, %c0_24] : memref<16x32xf32, #tpu.memory_space<vmem>>, vector<16x32xf32>
    tpu.vector_store %arg8[%c0_23, %c0_24], %40 {strides = array<i32>} : memref<16x32xf32, #tpu.memory_space<vmem>>, vector<16x32xf32>,
    return
  }
  func.func @transform_0(%arg0: i32) -> (i32, i32) {
    %c0_i32 = arith.constant 0 : i32
    %c0_i32_0 = arith.constant 0 : i32
    return %arg0, %c0_i32 : i32, i32
  }
  func.func @transform_1(%arg0: i32) -> (i32, i32) {
    %c0_i32 = arith.constant 0 : i32
    %c0_i32_0 = arith.constant 0 : i32
    %c0_i32_1 = arith.constant 0 : i32
    return %c0_i32, %c0_i32_0 : i32, i32
  }
  func.func @transform_2(%arg0: i32) -> (i32, i32) {
    %c0_i32 = arith.constant 0 : i32
    %c0_i32_0 = arith.constant 0 : i32
    %c0_i32_1 = arith.constant 0 : i32
    return %c0_i32, %c0_i32_0 : i32, i32
  }
  func.func @transform_3(%arg0: i32) -> (i32, i32) {
    %c0_i32 = arith.constant 0 : i32
    %c0_i32_0 = arith.constant 0 : i32
    %c0_i32_1 = arith.constant 0 : i32
    return %c0_i32, %c0_i32_0 : i32, i32
  }
  func.func @transform_4(%arg0: i32) -> (i32, i32) {
    %c0_i32 = arith.constant 0 : i32
    %c0_i32_0 = arith.constant 0 : i32
    %c0_i32_1 = arith.constant 0 : i32
    return %c0_i32, %c0_i32_0 : i32, i32
  }
  func.func @transform_5(%arg0: i32) -> (i32, i32) {
    %c0_i32 = arith.constant 0 : i32
    %c0_i32_0 = arith.constant 0 : i32
    %c0_i32_1 = arith.constant 0 : i32
    return %c0_i32, %c0_i32_0 : i32, i32
  }
  func.func @transform_6(%arg0: i32) -> (i32, i32) {
    %c0_i32 = arith.constant 0 : i32
    %c0_i32_0 = arith.constant 0 : i32
    %c0_i32_1 = arith.constant 0 : i32
    return %c0_i32, %c0_i32_0 : i32, i32
  }
  func.func @transform_7(%arg0: i32) -> (i32, i32) {
    %c0_i32 = arith.constant 0 : i32
    %c0_i32_0 = arith.constant 0 : i32
    return %arg0, %c0_i32 : i32, i32
  }
}

</mosaic_0001>

<bundles_post_ra>
// kernel: tpu_custom_call.1
= control target key start
LH: loop header
LB: loop body
LE: loop exit
PB: predicated region body
PF: predicated region fallthrough
CT: control target
= control target key end

     0   :  { %6 = vsyncpa [#allocation3], 0  ;;  %s124_s0 = inlined_call_operand.hbm [shape: f32[8,128], index: 0, kind: input, shape index: {}]   ;;  %s125_s1 = inlined_call_operand.hbm [shape: f32[8,128], index: 1, kind: output, shape index: {}]  }
   0x1   :  { %7 = vsyncpa [#allocation4], 0  ;;  %s88_s6 = smov [#allocation2]   ;;  %s40_s10 = scalar_lea.hbm %s124_s0, 128 }
   0x2   :  { %s14_s7 = sshll.u32 %s88_s6, 4  ;;  %p41_p0 = scmp.ne.s32.totalorder %s124_s0, %s40_s10  ;;  %s15_s7 = int_to_ptr.vmem [resolvable:$true] %s14_s7 }
   0x3   :  { %p44_p1 = scmp.lt.u32.totalorder %s40_s10, %s124_s0 }
   0x5   :  { %p46_p2 = pnand %p44_p1, %p41_p0 }
   0x7   :  { %49 = shalt.err (!%p46_p2)
}
   0x8   :  { %s50_s15 = scalar_lea.vmem %s15_s7, 128  ;;  %p55_p4 = scmp.lt.s32.totalorder %s15_s7, %s15_s7 }
   0x9   :  { %p51_p3 = scmp.ne.s32.totalorder %s15_s7, %s50_s15  ;;  %p56_p5 = scmp.lt.s32.totalorder %s50_s15, %s50_s15 }
   0xb   :  { %p57_p6 = por %p56_p5, %p55_p4 }
   0xd   :  { %p58_p7 = pnand %p57_p6, %p51_p3 }
   0xf   :  { %61 = shalt.err (!%p58_p7)
}
  0x10   :  { %17 = dma.hbm_to_vmem [thread:$0]  %s124_s0, 128, %s15_s7, [#allocation3]  }
  0x11   :  { %84 = dma.done.wait [#allocation3], 128  }
  0x12   :  { %85 = vsyncadd [#allocation3], 4294967168  ;;  %s89_s18 = smov [#allocation5]   ;;  %v21_v0 = vld [vmem:[#allocation2] sm:$0xff] }
  0x13   :  { %s29_s19 = sshll.u32 %s89_s18, 4  ;;  %22 = vst [vmem:[#allocation5] sm:$0xff] %v21_v0  ;;  %s30_s19 = int_to_ptr.vmem [resolvable:$true] %s29_s19 }
  0x14   :  { %s62_s20 = scalar_lea.vmem %s30_s19, 128  ;;  %p67_p9 = scmp.lt.s32.totalorder %s30_s19, %s30_s19 }
  0x15   :  { %p63_p8 = scmp.ne.s32.totalorder %s30_s19, %s62_s20  ;;  %p68_p10 = scmp.lt.s32.totalorder %s62_s20, %s62_s20 }
  0x17   :  { %p69_p11 = por %p68_p10, %p67_p9 }
  0x19   :  { %p70_p12 = pnand %p69_p11, %p63_p8 }
  0x1b   :  { %73 = shalt.err (!%p70_p12)
}
  0x1c   :  { %s74_s23 = scalar_lea.hbm %s125_s1, 128 }
  0x1d   :  { %p75_p13 = scmp.ne.s32.totalorder %s125_s1, %s74_s23  ;;  %p78_p0 = scmp.lt.u32.totalorder %s74_s23, %s125_s1 }
  0x1f   :  { %p80_p1 = pnand %p78_p0, %p75_p13 }
  0x21   :  { %83 = shalt.err (!%p80_p1)
}
  0x22   :  { %32 = dma.vmem_to_hbm [thread:$0]  %s30_s19, 128, %s125_s1, [#allocation4]  }
  0x23   :  { %86 = dma.done.wait [#allocation4], 128  }
  0x24   :  { %87 = vsyncadd [#allocation4], 4294967168 }
  0x25   :  { %36 = vsyncpa [#allocation3], 1 }
  0x26   :  { %37 = vsyncpa [#allocation4], 1 }

// kernel: tpu_custom_call.1
= control target key start
LH: loop header
LB: loop body
LE: loop exit
PB: predicated region body
PF: predicated region fallthrough
CT: control target
= control target key end

     0   :  { %vm29_vm0 = vcmask 261120   ;;  %s594_s0 = inlined_call_operand.vmem [shape: f32[16,32], index: 0, kind: input, shape index: {}]   ;;  %s595_s1 = inlined_call_operand.vmem [shape: f32[1,32], index: 1, kind: input, shape index: {}]   ;;  %s596_s2 = inlined_call_operand.vmem [shape: f32[1,32], index: 2, kind: input, shape index: {}]   ;;  %s597_s3 = inlined_call_operand.vmem [shape: f32[32,128], index: 3, kind: input, shape index: {}]   ;;  %s598_s4 = inlined_call_operand.vmem [shape: f32[1,128], index: 4, kind: input, shape index: {}]   ;;  %s599_s5 = inlined_call_operand.vmem [shape: f32[128,32], index: 5, kind: input, shape index: {}]   ;;  %s600_s6 = inlined_call_operand.vmem [shape: f32[1,32], index: 6, kind: input, shape index: {}]   ;;  %s601_s7 = inlined_call_operand.hbm [shape: f32[16,32], index: 7, kind: output, shape index: {}]  }
   0x1   :  { %v485_v0 = vld [vmem:[%s594_s0] sm:$0xff]  ;;  %v490_v1 = vld [vmem:[%s594_s0 + $0x8] sm:$0xff] }
   0x2   :  { %12 = vsyncpa [#allocation3], 0  ;;  %v30_v2 = vsel %vm29_vm0, %v485_v0, 0.0  ;;  %v38_v3 = vmul.f32 %v485_v0, %v485_v0  ;;  %v39_v4 = vmul.f32 %v490_v1, %v490_v1  ;;  %v33_v6 = vsel %vm29_vm0, %v490_v1, 0.0  ;;  %v80_v8 = vld [vmem:[%s597_s3] sm:$0xff]  ;;  %v81_v9 = vld [vmem:[%s597_s3 + $0x8] sm:$0xff] }
   0x3   :  { %31 = vadd.xlane.f32.xlu0 %v30_v2  ;;  %v82_v10 = vld [vmem:[%s597_s3 + $0x10] sm:$0xff]  ;;  %v368_v11 = vpack.c.bf16 %v81_v9, %v80_v8  ;;  %v83_v12 = vld [vmem:[%s597_s3 + $0x18] sm:$0xff]  ;;  %v174_v14 = vld [vmem:[%s599_s5] sm:$0xff] }
   0x4   :  { %v40_v5 = vsel %vm29_vm0, %v38_v3, 0.0  ;;  %v43_v7 = vsel %vm29_vm0, %v39_v4, 0.0  ;;  %v372_v13 = vpack.c.bf16 %v83_v12, %v82_v10  ;;  %v175_v15 = vld [vmem:[%s599_s5 + $0x8] sm:$0xff]  ;;  %v176_v16 = vld [vmem:[%s599_s5 + $0x10] sm:$0xff]  ;;  %v177_v18 = vld [vmem:[%s599_s5 + $0x18] sm:$0xff] }
   0x5   :  { %41 = vadd.xlane.f32.xlu1 %v40_v5  ;;  %369 = vmatprep.subr.bf16.mxu0 %v368_v11  ;;  %v376_v17 = vpack.c.bf16 %v175_v15, %v174_v14  ;;  %v380_v19 = vpack.c.bf16 %v177_v18, %v176_v16  ;;  %v178_v20 = vld [vmem:[%s599_s5 + $0x20] sm:$0xff]  ;;  %v179_v21 = vld [vmem:[%s599_s5 + $0x28] sm:$0xff]  ;;  %v180_v23 = vld [vmem:[%s599_s5 + $0x30] sm:$0xff] }
   0x6   :  { %371 = vmatpush3.bf16.msra.mxu0 %v368_v11  ;;  %v384_v22 = vpack.c.bf16 %v179_v21, %v178_v20  ;;  %v181_v24 = vld [vmem:[%s599_s5 + $0x38] sm:$0xff]  ;;  %v182_v26 = vld [vmem:[%s599_s5 + $0x40] sm:$0xff]  ;;  %v183_v27 = vld [vmem:[%s599_s5 + $0x48] sm:$0xff] }
   0x7   :  { %34 = vadd.xlane.f32.xlu0 %v33_v6  ;;  %373 = vmatprep.subr.bf16.mxu0 %v372_v13  ;;  %v388_v25 = vpack.c.bf16 %v181_v24, %v180_v23  ;;  %v392_v28 = vpack.c.bf16 %v183_v27, %v182_v26  ;;  %v184_v29 = vld [vmem:[%s599_s5 + $0x50] sm:$0xff]  ;;  %v185_v30 = vld [vmem:[%s599_s5 + $0x58] sm:$0xff]  ;;  %v186_v32 = vld [vmem:[%s599_s5 + $0x60] sm:$0xff] }
   0x8   :  { %377 = vmatprep.subr.bf16.mxu1 %v376_v17  ;;  %v396_v31 = vpack.c.bf16 %v185_v30, %v184_v29  ;;  %v187_v33 = vld [vmem:[%s599_s5 + $0x68] sm:$0xff]  ;;  %v292_v53 = vld [vmem:[%s595_s1] ss:$0 sm:$0xff]  ;;  %v188_v63 = vld [vmem:[%s599_s5 + $0x70] sm:$0xff] }
   0x9   :  { %44 = vadd.xlane.f32.xlu1 %v43_v7  ;;  %379 = vmatpush3.bf16.msra.mxu1 %v376_v17  ;;  %v400_v34 = vpack.c.bf16 %v187_v33, %v186_v32  ;;  %v293_v55 = vld [vmem:[%s596_s2] ss:$0 sm:$0xff]  ;;  %v189_v2 = vld [vmem:[%s599_s5 + $0x78] sm:$0xff]  ;;  %s439_s5 = smov [#allocation2]  }
   0xa   :  { %375 = vmatpush3.bf16.msra.mxu0 %v372_v13  ;;  %381 = vmatprep.subr.bf16.mxu1 %v380_v19  ;;  %v404_v3 = vpack.c.bf16 %v189_v2, %v188_v63  ;;  %v294_v4 = vld [vmem:[%s598_s4] ss:$0 sm:$0xff]  ;;  %s281_s24 = sshll.u32 %s439_s5, 4  ;;  %s282_s24 = int_to_ptr.vmem [resolvable:$true] %s281_s24 }
   0xb   :  { %v297_v11 = vld [vmem:[%s600_s6] ss:$0 sm:$0xff]  ;;  %s415_s4 = scalar_lea.vmem %s282_s24, 256  ;;  %p420_p1 = scmp.lt.s32.totalorder %s282_s24, %s282_s24 }
   0xc   :  { %p416_p0 = scmp.ne.s32.totalorder %s282_s24, %s415_s4  ;;  %p421_p2 = scmp.lt.s32.totalorder %s415_s4, %s415_s4 }
   0xd   :  { %383 = vmatpush3.bf16.msra.mxu1 %v380_v19 }
   0xe   :  { %385 = vmatprep.subr.bf16.mxu1 %v384_v22  ;;  %p422_p3 = por %p421_p2, %p420_p1 }
  0x10   :  { %p423_p4 = pnand %p422_p3, %p416_p0 }
  0x11   :  { %387 = vmatpush3.bf16.msra.mxu1 %v384_v22 }
  0x12   :  { %389 = vmatprep.subr.bf16.mxu1 %v388_v25 }
  0x15   :  { %391 = vmatpush3.bf16.msra.mxu1 %v388_v25 }
  0x16   :  { %393 = vmatprep.subr.bf16.mxu1 %v392_v28 }
  0x19   :  { %395 = vmatpush3.bf16.msra.mxu1 %v392_v28 }
  0x1a   :  { %397 = vmatprep.subr.bf16.mxu1 %v396_v31 }
  0x1d   :  { %399 = vmatpush3.bf16.msra.mxu1 %v396_v31 }
  0x1e   :  { %401 = vmatprep.subr.bf16.mxu1 %v400_v34 }
  0x21   :  { %403 = vmatpush3.bf16.msra.mxu1 %v400_v34 }
  0x22   :  { %405 = vmatprep.subr.bf16.mxu1 %v404_v3 }
  0x25   :  { %407 = vmatpush3.bf16.msra.mxu1 %v404_v3 }
  0x90   :  { %v32_v35 = vpop.xlane.xlu0 %31 }
  0x91   :  { %v36_v36 = vmul.f32 0.03125, %v32_v35 }
  0x92   :  { %v42_v37 = vpop.xlane.xlu1 %41 }
  0x93   :  { %v48_v38 = vmul.f32 %v36_v36, %v36_v36  ;;  %v46_v39 = vmul.f32 0.03125, %v42_v37  ;;  %v58_v51 = vsub.f32 %v485_v0, %v36_v36 }
  0x94   :  { %v35_v40 = vpop.xlane.xlu0 %34 }
  0x95   :  { %v50_v41 = vsub.f32 %v46_v39, %v48_v38  ;;  %v37_v42 = vmul.f32 0.03125, %v35_v40 }
  0x96   :  { %v45_v43 = vpop.xlane.xlu1 %44 }
  0x97   :  { %v52_v44 = vmax.f32 %v50_v41, 0.0  ;;  %v49_v45 = vmul.f32 %v37_v42, %v37_v42  ;;  %v47_v46 = vmul.f32 0.03125, %v45_v43  ;;  %v59_v56 = vsub.f32 %v490_v1, %v37_v42 }
  0x99   :  { %v54_v47 = vadd.f32 1e-05, %v52_v44  ;;  %v51_v48 = vsub.f32 %v47_v46, %v49_v45 }
  0x9b   :  { %411 = vrsqrt.f32 %v54_v47  ;;  %v53_v49 = vmax.f32 %v51_v48, 0.0 }
  0x9d   :  { %v55_v50 = vadd.f32 1e-05, %v53_v49 }
  0x9f   :  { %413 = vrsqrt.f32 %v55_v50 }
  0xa5   :  { %v412_v52 = vpop.eup %411 }
  0xa6   :  { %v60_v54 = vmul.f32 %v412_v52, %v58_v51 }
  0xa8   :  { %v69_v57 = vmul.f32 %v292_v53, %v60_v54 }
  0xa9   :  { %v414_v58 = vpop.eup %413 }
  0xaa   :  { %v61_v59 = vmul.f32 %v414_v58, %v59_v56  ;;  %v78_v60 = vadd.f32 %v293_v55, %v69_v57 }
  0xac   :  { %v70_v61 = vmul.f32 %v292_v53, %v61_v59  ;;  %330 = vmatprep.mubr.msk.f32.mxu0 %vm29_vm0, %v78_v60 }
  0xae   :  { %v79_v62 = vadd.f32 %v293_v55, %v70_v61 }
  0xb0   :  { %331 = vmatmul.mubr.msk.f32.vlgmr.msra.gmra.mrb[0].mxu0 %vm29_vm0, %v79_v62 }
 0x183   :  { %v332_v5 = vpop.f32.mrb[0].mxu0 }
 0x184   :  { %v169_v6 = vadd.f32 %v332_v5, %v294_v4  ;;  %v163_v7 = vpop.f32.mrb[1].mxu0 }
 0x185   :  { %v164_v8 = vadd.f32 %v294_v4, %v163_v7 }
 0x186   :  { %v173_v10 = vmax.f32 %v169_v6, 0.0 }
 0x187   :  { %v172_v9 = vmax.f32 %v164_v8, 0.0 }
 0x189   :  { %365 = vmatprep.mubr.f32.mxu1 %v172_v9 }
 0x18a   :  { %366 = vmatmul.mubr.f32.vlgmr.msra.gmra.mrb[0].mxu1 %v173_v10 }
 0x25d   :  { %v367_v12 = vpop.f32.mrb[0].mxu1 }
 0x25e   :  { %v269_v13 = vadd.f32 %v367_v12, %v297_v11  ;;  %v263_v14 = vpop.f32.mrb[1].mxu1 }
 0x25f   :  { %v264_v15 = vadd.f32 %v297_v11, %v263_v14 }
 0x260   :  { %v273_v16 = vadd.f32 %v269_v13, %v490_v1 }
 0x261   :  { %v272_v17 = vadd.f32 %v264_v15, %v485_v0 }
 0x262   :  { %275 = vst.msk [vmem:[#allocation2 + $0x8] sm:$0xff] %vm29_vm0, %v273_v16 }
 0x263   :  { %274 = vst.msk [vmem:[#allocation2] sm:$0xff] %vm29_vm0, %v272_v17 }
 0x264   :  { %426 = shalt.err (!%p423_p4)
}
 0x265   :  { %s427_s26 = scalar_lea.hbm %s601_s7, 256 }
 0x266   :  { %p428_p5 = scmp.ne.s32.totalorder %s601_s7, %s427_s26  ;;  %p431_p6 = scmp.lt.u32.totalorder %s427_s26, %s601_s7 }
 0x268   :  { %p433_p7 = pnand %p431_p6, %p428_p5 }
 0x26a   :  { %436 = shalt.err (!%p433_p7)
}
 0x26b   :  { %s440_s30 = smov 128   ;;  %s441_s8 = smov 8  }
 0x26c   :  { %287 = dma.vmem_to_hbm [thread:$0]  %s282_s24, 256, %s601_s7, [#allocation3], %s440_s30, %s440_s30, %s441_s8  }
 0x26d   :  { %437 = dma.done.wait [#allocation3], 256  }
 0x26e   :  { %438 = vsyncadd [#allocation3], 4294967040 }
 0x26f   :  { %291 = vsyncpa [#allocation3], 1 }

</bundles_post_ra>
